<compile_context>
chip_gen: v7x
topology: tpu7x:2x2x1
jax: 0.10.0
libtpu: 0.0.40
codegen_flags: <defaults>
</compile_context>

<pallas_src>
import numpy as np
import jax
import jax.numpy as jnp
from jax import lax
from jax.experimental import pallas as pl
from jax.experimental.pallas import tpu as pltpu


def _full_spec(shape):
    n = len(shape)
    return pl.BlockSpec(shape, lambda i, _n=n: (0,) * _n)


# ----------------------------------------------------------------------------
# Fused kernel: matching attention + shared MLP (both branches) + similarity
# ----------------------------------------------------------------------------
def _fused_kernel(x_ref, xhd_ref, gxf_ref, gm_ref, lowsel_ref, gid_oh_ref,
                  seg_ohT_ref, rep_ohT_ref,
                  w1a_ref, w1b_ref, b1_ref, ga_ref, be_ref, w2_ref, b2_ref,
                  sim_ref):
    f32 = jnp.float32
    x = x_ref[...]            # [N, D]   all node features
    xhd = xhd_ref[...]        # [M, D]   high-degree node feats (all graphs)
    gxf = gxf_ref[...]        # [Mg, D]  high-degree node feats of graph gid
    gm = gm_ref[...]          # [M, G]   one-hot graph membership of xhd rows
    seg_ohT = seg_ohT_ref[...]  # [G*Mg, G]  row r -> graph r//Mg one-hot
    rep_ohT = rep_ohT_ref[...]  # [G*Mg, Mg] row r -> column r%Mg one-hot

    # --- attention logits: a[i, j] = <xhd_i, gxf_j>  (MXU) ---
    a = lax.dot_general(xhd, gxf, (((1,), (1,)), ((), ())),
                        preferred_element_type=f32)                     # [M, Mg]

    # Single global shift (softmax is shift-invariant) -> one exp pass (EUP).
    e = jnp.exp(a - jnp.max(a))                                         # [M, Mg]

    # Segment softmax over source graphs (torch_geometric.utils.softmax):
    #   a1 = e / (gm @ (gm.T @ e))   -- segment sums done on the MXU.
    colsum = lax.dot_general(gm, e, (((0,), (0,)), ((), ())),
                             preferred_element_type=f32)                # [G, Mg]
    den1 = jnp.dot(gm, colsum, preferred_element_type=f32)              # [M, Mg]
    a1 = e / den1
    sum_mu1 = jnp.dot(a1, gxf, preferred_element_type=f32)              # [M, D]

    # Row softmax (softmax(a.T, dim=0) == row-softmax of a).
    p = e / jnp.sum(e, axis=1, keepdims=True)                           # [M, Mg]

    # sum_mu2 as ONE masked matmul:
    #   p_masked[(g, j), i] = gm[i, g] * p[i, j];  sum_mu2 = p_masked @ xhd
    gm_rep = lax.dot_general(seg_ohT, gm, (((1,), (1,)), ((), ())),
                             preferred_element_type=f32)                # [G*Mg, M]
    p_rep = lax.dot_general(rep_ohT, p, (((1,), (1,)), ((), ())),
                            preferred_element_type=f32)                 # [G*Mg, M]
    sum_mu2 = jnp.dot(gm_rep * p_rep, xhd,
                      preferred_element_type=f32)                       # [G*Mg, D]

    # gxf replicated once per graph (rows of the "single" branch input).
    gxf_rep = jnp.dot(rep_ohT, gxf, preferred_element_type=f32)         # [G*Mg, D]

    # --- shared MLP (weights resident in VMEM, loaded once per forward) ---
    w1a = w1a_ref[...]; w1b = w1b_ref[...]; b1 = b1_ref[...]
    ga = ga_ref[...]; be = be_ref[...]
    w2 = w2_ref[...]; b2 = b2_ref[...]

    def mlp(xa, xb):
        # Linear(2D->D) on the virtual concat [xa | xb] (never materialized),
        # then LayerNorm -> ReLU -> Linear(D->D).
        h = (jnp.dot(xa, w1a, preferred_element_type=f32)
             + jnp.dot(xb, w1b, preferred_element_type=f32) + b1)
        mean = jnp.mean(h, axis=-1, keepdims=True)
        var = jnp.mean((h - mean) ** 2, axis=-1, keepdims=True)
        hn = (h - mean) * lax.rsqrt(var + f32(1e-5)) * ga + be
        r = jnp.maximum(hn, f32(0.0))
        return jnp.dot(r, w2, preferred_element_type=f32) + b2

    out_multi = mlp(xhd, sum_mu1)                                       # [M, D]
    out_single = mlp(gxf_rep, sum_mu2)                                  # [G*Mg, D]

    # --- pooled sums + per-graph L2-normalized similarity (MXU one-hots) ---
    plow = jnp.dot(lowsel_ref[...], x, preferred_element_type=f32)      # [G, D]
    # gxlow = low-degree pooled sum of graph `gid`; by construction it is shared
    # across ALL G rows of s1 (matches the PyTorch reference).
    gxlow = jnp.dot(gid_oh_ref[...], plow, preferred_element_type=f32)  # [1, D]

    s1 = lax.dot_general(seg_ohT, out_single, (((0,), (0,)), ((), ())),
                         preferred_element_type=f32) + gxlow            # [G, D]
    s2 = plow + lax.dot_general(gm, out_multi, (((0,), (0,)), ((), ())),
                                preferred_element_type=f32)             # [G, D]

    def l2n(v):
        n = jnp.sqrt(jnp.sum(v * v, axis=-1, keepdims=True))
        return v / jnp.maximum(n, f32(1e-12))

    sim_ref[...] = jnp.sum(l2n(s1) * l2n(s2), axis=-1, keepdims=True)   # [G, 1]


def fused_forward_pallas(x, xhd, gxf, gm, lowsel, gid_oh, seg_ohT, rep_ohT,
                         params):
    N, D = x.shape
    G = gm.shape[1]
    w1a = params["w1"][:D]          # first D rows multiply the node features
    w1b = params["w1"][D:]          # last D rows multiply the aggregated mu
    in_arrays = (x, xhd, gxf, gm, lowsel, gid_oh, seg_ohT, rep_ohT,
                 w1a, w1b, params["b1"], params["gamma"], params["beta"],
                 params["w2"], params["b2"])
    return pl.pallas_call(
        _fused_kernel,
        grid=(1,),
        in_specs=[_full_spec(tuple(a.shape)) for a in in_arrays],
        out_specs=_full_spec((G, 1)),
        out_shape=jax.ShapeDtypeStruct((G, 1), jnp.float32),
        compiler_params=pltpu.CompilerParams(
            dimension_semantics=("arbitrary",)),
    )(*in_arrays)


# ----------------------------------------------------------------------------
# Parameters (deterministic, in-script)
# ----------------------------------------------------------------------------
def make_params(key, edge_dim, emb_dim):
    ks = jax.random.split(key, 8)
    p = {
        "w1": (jax.random.normal(ks[0], (2 * emb_dim, emb_dim)) * 0.1).astype(jnp.float32),
        "b1": (jax.random.normal(ks[1], (1, emb_dim)) * 0.01).astype(jnp.float32),
        "gamma": (1.0 + 0.1 * jax.random.normal(ks[2], (1, emb_dim))).astype(jnp.float32),
        "beta": (0.05 * jax.random.normal(ks[3], (1, emb_dim))).astype(jnp.float32),
        "w2": (jax.random.normal(ks[4], (emb_dim, emb_dim)) * 0.1).astype(jnp.float32),
        "b2": (jax.random.normal(ks[5], (1, emb_dim)) * 0.01).astype(jnp.float32),
        # BioGMNConv.edge_encoder (Linear(edge_dim, emb_dim)) — never called in forward().
        "we": (jax.random.normal(ks[6], (edge_dim, emb_dim)) * 0.1).astype(jnp.float32),
        "be": (jax.random.normal(ks[7], (1, emb_dim)) * 0.01).astype(jnp.float32),
    }
    return p


# ----------------------------------------------------------------------------
# Forward wrapper: host-side static-shape index glue + one fused kernel call
# ----------------------------------------------------------------------------
def ada_gmn_forward(gid, x, edge_index, edge_attr, batch, params):
    del edge_attr  # GMNConv.forward never calls the edge encoders
    x = jnp.asarray(x, jnp.float32)
    N, D = x.shape
    bm = np.asarray(batch)
    ei = np.asarray(edge_index)

    # Graph-structure glue (boolean-mask gathers need static shapes -> numpy,
    # computed once per batch structure).
    deg = np.bincount(ei[0], minlength=N)
    mask = deg > 1
    G = int(bm.max()) + 1
    hidx = np.where(mask)[0]                      # high-degree nodes (all graphs)
    gfidx = np.where((bm == gid) & mask)[0]       # high-degree nodes of graph gid
    lidx = np.where(~mask)[0]                     # low-degree nodes (all graphs)
    M, Mg = hidx.size, gfidx.size
    fhb = bm[hidx]                                # filtered_high_batch

    gm = np.zeros((M, G), np.float32)
    gm[np.arange(M), fhb] = 1.0                   # [M, G] one-hot membership
    lowsel = np.zeros((G, N), np.float32)
    lowsel[bm[lidx], lidx] = 1.0                  # [G, N] low-degree selector
    gid_oh = np.zeros((1, G), np.float32)
    gid_oh[0, gid] = 1.0
    # row r of the flattened "single" branch corresponds to (graph r//Mg, col r%Mg)
    seg_ohT = np.kron(np.eye(G, dtype=np.float32),
                      np.ones((Mg, 1), np.float32))          # [G*Mg, G]
    rep_ohT = np.tile(np.eye(Mg, dtype=np.float32), (G, 1))  # [G*Mg, Mg]

    xhd = x[hidx]                                 # [M, D]   high_degree_x
    gxf = x[gfidx]                                # [Mg, D]  gx_filtered

    sim = fused_forward_pallas(x, xhd, gxf,
                               jnp.asarray(gm), jnp.asarray(lowsel),
                               jnp.asarray(gid_oh), jnp.asarray(seg_ohT),
                               jnp.asarray(rep_ohT), params)
    return sim[:, 0]                              # [G]


# ----------------------------------------------------------------------------
# Pure numpy reference (mirrors the PyTorch forward)
# ----------------------------------------------------------------------------
def reference_forward(gid, x, edge_index, batch, params):
    x = np.asarray(x, np.float64)
    p = {k: np.asarray(v, np.float64) for k, v in params.items()}
    N, D = x.shape
    bm = np.asarray(batch)
    ei = np.asarray(edge_index)
    deg = np.bincount(ei[0], minlength=N)
    mask = deg > 1
    G = int(bm.max()) + 1

    def mlp(z):
        h = z @ p["w1"] + p["b1"]
        mean = h.mean(-1, keepdims=True)
        var = ((h - mean) ** 2).mean(-1, keepdims=True)
        hn = (h - mean) / np.sqrt(var + 1e-5) * p["gamma"] + p["beta"]
        return np.maximum(hn, 0.0) @ p["w2"] + p["b2"]

    gsel = bm == gid
    gx = x[gsel]
    mask_g = mask[gsel]
    gxf = gx[mask_g]
    xhd = x[mask]
    fhb = bm[mask]
    Mg = gxf.shape[0]

    a = xhd @ gxf.T
    a1 = np.zeros_like(a)
    for g in range(G):
        rows = fhb == g
        if rows.sum() == 0:
            continue
        sub = a[rows] - a[rows].max(axis=0, keepdims=True)
        e = np.exp(sub)
        a1[rows] = e / e.sum(axis=0, keepdims=True)
    sum_mu1 = a1 @ gxf
    out_multi = mlp(np.concatenate([xhd, sum_mu1], -1))

    pe = np.exp(a - a.max(axis=1, keepdims=True))
    prob = pe / pe.sum(axis=1, keepdims=True)
    sum_mu2 = np.zeros((G, Mg, D))
    for g in range(G):
        rows = fhb == g
        sum_mu2[g] = prob[rows].T @ xhd[rows]
    inn2 = np.concatenate([np.broadcast_to(gxf, (G, Mg, D)), sum_mu2], -1)
    out_single = mlp(inn2.reshape(-1, 2 * D)).reshape(G, Mg, D)

    sims1 = []
    for g in range(G):
        gg = gx.copy()
        gg[mask_g] = out_single[g]
        s = gg.sum(0)
        sims1.append(s / max(np.linalg.norm(s), 1e-12))
    o1 = np.stack(sims1)

    x_new = x.copy()
    x_new[mask] = out_multi
    pooled = np.stack([x_new[bm == g].sum(0) for g in range(G)])
    o2 = pooled / np.maximum(np.linalg.norm(pooled, axis=-1, keepdims=True), 1e-12)
    return np.sum(o1 * o2, -1)


# ----------------------------------------------------------------------------
if __name__ == "__main__":
    edge_dim, emb_dim = 9, 32
    N, G = 24, 3
    gid = 0

    key = jax.random.PRNGKey(0)
    kx, kp, ke = jax.random.split(key, 3)
    x = jax.random.normal(kx, (N, emb_dim), jnp.float32)
    batch = np.repeat(np.arange(G), N // G)               # [24]

    # deterministic edges: every node -> next node; even nodes get a 2nd edge
    src, dst = [], []
    for i in range(N):
        src.append(i); dst.append((i + 1) % N)
        if i % 2 == 0:
            src.append(i); dst.append((i + 2) % N)
    edge_index = np.stack([np.array(src), np.array(dst)])  # [2, 36]
    edge_attr = jax.random.normal(ke, (edge_index.shape[1], edge_dim), jnp.float32)

    params = make_params(kp, edge_dim, emb_dim)

    sim = ada_gmn_forward(gid, x, edge_index, edge_attr, batch, params)
    sim = jax.block_until_ready(sim)

    ref = reference_forward(gid, x, edge_index, batch, params)
    np.testing.assert_allclose(np.asarray(sim), ref, rtol=5e-3, atol=5e-3)
    print("KERNEL_OK")
</pallas_src>

<mosaic_0001>
module attributes {stable_mosaic.version = 11 : i64} {
  func.func @_fused_kernel(%arg0: i32, %arg1: memref<24x32xf32, #tpu.memory_space<vmem>>, %arg2: memref<12x32xf32, #tpu.memory_space<vmem>>, %arg3: memref<4x32xf32, #tpu.memory_space<vmem>>, %arg4: memref<12x3xf32, #tpu.memory_space<vmem>>, %arg5: memref<3x24xf32, #tpu.memory_space<vmem>>, %arg6: memref<1x3xf32, #tpu.memory_space<vmem>>, %arg7: memref<12x3xf32, #tpu.memory_space<vmem>>, %arg8: memref<12x4xf32, #tpu.memory_space<vmem>>, %arg9: memref<32x32xf32, #tpu.memory_space<vmem>>, %arg10: memref<32x32xf32, #tpu.memory_space<vmem>>, %arg11: memref<1x32xf32, #tpu.memory_space<vmem>>, %arg12: memref<1x32xf32, #tpu.memory_space<vmem>>, %arg13: memref<1x32xf32, #tpu.memory_space<vmem>>, %arg14: memref<32x32xf32, #tpu.memory_space<vmem>>, %arg15: memref<1x32xf32, #tpu.memory_space<vmem>>, %arg16: memref<3x1xf32, #tpu.memory_space<vmem>>) attributes {dimension_semantics = [#tpu.dimension_semantics<arbitrary>], iteration_bounds = array<i64: 1>, scalar_prefetch = 0 : i64, scratch_operands = 0 : i64, tpu.core_type = #tpu.core_type<tc>, window_params = [{pipeline_mode = #tpu.pipeline_mode<synchronous>, transform_indices = @transform_0, window_bounds = array<i64: 24, 32>}, {pipeline_mode = #tpu.pipeline_mode<synchronous>, transform_indices = @transform_1, window_bounds = array<i64: 12, 32>}, {pipeline_mode = #tpu.pipeline_mode<synchronous>, transform_indices = @transform_2, window_bounds = array<i64: 4, 32>}, {pipeline_mode = #tpu.pipeline_mode<synchronous>, transform_indices = @transform_3, window_bounds = array<i64: 12, 3>}, {pipeline_mode = #tpu.pipeline_mode<synchronous>, transform_indices = @transform_4, window_bounds = array<i64: 3, 24>}, {pipeline_mode = #tpu.pipeline_mode<synchronous>, transform_indices = @transform_5, window_bounds = array<i64: 1, 3>}, {pipeline_mode = #tpu.pipeline_mode<synchronous>, transform_indices = @transform_6, window_bounds = array<i64: 12, 3>}, {pipeline_mode = #tpu.pipeline_mode<synchronous>, transform_indices = @transform_7, window_bounds = array<i64: 12, 4>}, {pipeline_mode = #tpu.pipeline_mode<synchronous>, transform_indices = @transform_8, window_bounds = array<i64: 32, 32>}, {pipeline_mode = #tpu.pipeline_mode<synchronous>, transform_indices = @transform_9, window_bounds = array<i64: 32, 32>}, {pipeline_mode = #tpu.pipeline_mode<synchronous>, transform_indices = @transform_10, window_bounds = array<i64: 1, 32>}, {pipeline_mode = #tpu.pipeline_mode<synchronous>, transform_indices = @transform_11, window_bounds = array<i64: 1, 32>}, {pipeline_mode = #tpu.pipeline_mode<synchronous>, transform_indices = @transform_12, window_bounds = array<i64: 1, 32>}, {pipeline_mode = #tpu.pipeline_mode<synchronous>, transform_indices = @transform_13, window_bounds = array<i64: 32, 32>}, {pipeline_mode = #tpu.pipeline_mode<synchronous>, transform_indices = @transform_14, window_bounds = array<i64: 1, 32>}, {pipeline_mode = #tpu.pipeline_mode<synchronous>, transform_indices = @transform_15, window_bounds = array<i64: 3, 1>}]} {
    %c0 = arith.constant 0 : index
    %c0_0 = arith.constant 0 : index
    %0 = vector.load %arg1[%c0, %c0_0] : memref<24x32xf32, #tpu.memory_space<vmem>>, vector<24x32xf32>
    %c0_1 = arith.constant 0 : index
    %c0_2 = arith.constant 0 : index
    %1 = vector.load %arg2[%c0_1, %c0_2] : memref<12x32xf32, #tpu.memory_space<vmem>>, vector<12x32xf32>
    %c0_3 = arith.constant 0 : index
    %c0_4 = arith.constant 0 : index
    %2 = vector.load %arg3[%c0_3, %c0_4] : memref<4x32xf32, #tpu.memory_space<vmem>>, vector<4x32xf32>
    %c0_5 = arith.constant 0 : index
    %c0_6 = arith.constant 0 : index
    %3 = vector.load %arg4[%c0_5, %c0_6] : memref<12x3xf32, #tpu.memory_space<vmem>>, vector<12x3xf32>
    %c0_7 = arith.constant 0 : index
    %c0_8 = arith.constant 0 : index
    %4 = vector.load %arg7[%c0_7, %c0_8] : memref<12x3xf32, #tpu.memory_space<vmem>>, vector<12x3xf32>
    %c0_9 = arith.constant 0 : index
    %c0_10 = arith.constant 0 : index
    %5 = vector.load %arg8[%c0_9, %c0_10] : memref<12x4xf32, #tpu.memory_space<vmem>>, vector<12x4xf32>
    %cst = arith.constant dense<0.000000e+00> : vector<12x4xf32>
    %6 = tpu.matmul %1, %2, %cst {dimension_numbers = #tpu.dot_dimension_numbers<[1], [1], [0], [0], [0, 0, 1, 0], [], []>} : vector<12x32xf32>, vector<4x32xf32>, vector<12x4xf32> -> vector<12x4xf32>
    %7 = vector.shape_cast %6 : vector<12x4xf32> to vector<1x12x4xf32>
    %cst_11 = arith.constant dense<0xFF800000> : vector<1xf32>
    %8 = vector.multi_reduction <maximumf>, %7, %cst_11 [1, 2] : vector<1x12x4xf32> to vector<1xf32>
    %9 = vector.shape_cast %8 : vector<1xf32> to vector<1x1x1xf32>
    %10 = vector.extract %9[0, 0, 0] : f32 from vector<1x1x1xf32>
    %11 = vector.broadcast %10 : f32 to vector<12x4xf32>
    %12 = arith.subf %6, %11 : vector<12x4xf32>
    %13 = math.exp %12 : vector<12x4xf32>
    %cst_12 = arith.constant dense<0.000000e+00> : vector<3x4xf32>
    %14 = tpu.matmul %3, %13, %cst_12 {dimension_numbers = #tpu.dot_dimension_numbers<[0], [0], [1], [1], [0, 1, 1, 1], [], []>} : vector<12x3xf32>, vector<12x4xf32>, vector<3x4xf32> -> vector<3x4xf32>
    %cst_13 = arith.constant dense<0.000000e+00> : vector<12x4xf32>
    %15 = tpu.matmul %3, %14, %cst_13 {dimension_numbers = #tpu.dot_dimension_numbers<[1], [0], [0], [1], [0, 0, 1, 1], [], []>} : vector<12x3xf32>, vector<3x4xf32>, vector<12x4xf32> -> vector<12x4xf32>
    %16 = arith.divf %13, %15 : vector<12x4xf32>
    %cst_14 = arith.constant dense<0.000000e+00> : vector<12x32xf32>
    %17 = tpu.matmul %16, %2, %cst_14 {dimension_numbers = #tpu.dot_dimension_numbers<[1], [0], [0], [1], [0, 0, 1, 1], [], []>} : vector<12x4xf32>, vector<4x32xf32>, vector<12x32xf32> -> vector<12x32xf32>
    %cst_15 = arith.constant dense<0.000000e+00> : vector<12xf32>
    %18 = vector.multi_reduction <add>, %13, %cst_15 [1] : vector<12x4xf32> to vector<12xf32>
    %19 = vector.shape_cast %18 : vector<12xf32> to vector<12x1xf32>
    %20 = vector.broadcast %19 : vector<12x1xf32> to vector<12x4xf32>
    %21 = arith.divf %13, %20 : vector<12x4xf32>
    %cst_16 = arith.constant dense<0.000000e+00> : vector<12x12xf32>
    %22 = tpu.matmul %4, %3, %cst_16 {dimension_numbers = #tpu.dot_dimension_numbers<[1], [1], [0], [0], [0, 0, 1, 0], [], []>} : vector<12x3xf32>, vector<12x3xf32>, vector<12x12xf32> -> vector<12x12xf32>
    %cst_17 = arith.constant dense<0.000000e+00> : vector<12x12xf32>
    %23 = tpu.matmul %5, %21, %cst_17 {dimension_numbers = #tpu.dot_dimension_numbers<[1], [1], [0], [0], [0, 0, 1, 0], [], []>} : vector<12x4xf32>, vector<12x4xf32>, vector<12x12xf32> -> vector<12x12xf32>
    %24 = arith.mulf %22, %23 : vector<12x12xf32>
    %cst_18 = arith.constant dense<0.000000e+00> : vector<12x32xf32>
    %25 = tpu.matmul %24, %1, %cst_18 {dimension_numbers = #tpu.dot_dimension_numbers<[1], [0], [0], [1], [0, 0, 1, 1], [], []>} : vector<12x12xf32>, vector<12x32xf32>, vector<12x32xf32> -> vector<12x32xf32>
    %cst_19 = arith.constant dense<0.000000e+00> : vector<12x32xf32>
    %26 = tpu.matmul %5, %2, %cst_19 {dimension_numbers = #tpu.dot_dimension_numbers<[1], [0], [0], [1], [0, 0, 1, 1], [], []>} : vector<12x4xf32>, vector<4x32xf32>, vector<12x32xf32> -> vector<12x32xf32>
    %c0_20 = arith.constant 0 : index
    %c0_21 = arith.constant 0 : index
    %27 = vector.load %arg9[%c0_20, %c0_21] : memref<32x32xf32, #tpu.memory_space<vmem>>, vector<32x32xf32>
    %c0_22 = arith.constant 0 : index
    %c0_23 = arith.constant 0 : index
    %28 = vector.load %arg10[%c0_22, %c0_23] : memref<32x32xf32, #tpu.memory_space<vmem>>, vector<32x32xf32>
    %c0_24 = arith.constant 0 : index
    %c0_25 = arith.constant 0 : index
    %29 = vector.load %arg11[%c0_24, %c0_25] : memref<1x32xf32, #tpu.memory_space<vmem>>, vector<1x32xf32>
    %c0_26 = arith.constant 0 : index
    %c0_27 = arith.constant 0 : index
    %30 = vector.load %arg12[%c0_26, %c0_27] : memref<1x32xf32, #tpu.memory_space<vmem>>, vector<1x32xf32>
    %c0_28 = arith.constant 0 : index
    %c0_29 = arith.constant 0 : index
    %31 = vector.load %arg13[%c0_28, %c0_29] : memref<1x32xf32, #tpu.memory_space<vmem>>, vector<1x32xf32>
    %c0_30 = arith.constant 0 : index
    %c0_31 = arith.constant 0 : index
    %32 = vector.load %arg14[%c0_30, %c0_31] : memref<32x32xf32, #tpu.memory_space<vmem>>, vector<32x32xf32>
    %c0_32 = arith.constant 0 : index
    %c0_33 = arith.constant 0 : index
    %33 = vector.load %arg15[%c0_32, %c0_33] : memref<1x32xf32, #tpu.memory_space<vmem>>, vector<1x32xf32>
    %cst_34 = arith.constant dense<0.000000e+00> : vector<12x32xf32>
    %34 = tpu.matmul %1, %27, %cst_34 {dimension_numbers = #tpu.dot_dimension_numbers<[1], [0], [0], [1], [0, 0, 1, 1], [], []>} : vector<12x32xf32>, vector<32x32xf32>, vector<12x32xf32> -> vector<12x32xf32>
    %cst_35 = arith.constant dense<0.000000e+00> : vector<12x32xf32>
    %35 = tpu.matmul %17, %28, %cst_35 {dimension_numbers = #tpu.dot_dimension_numbers<[1], [0], [0], [1], [0, 0, 1, 1], [], []>} : vector<12x32xf32>, vector<32x32xf32>, vector<12x32xf32> -> vector<12x32xf32>
    %36 = arith.addf %34, %35 : vector<12x32xf32>
    %37 = vector.broadcast %29 : vector<1x32xf32> to vector<12x32xf32>
    %38 = arith.addf %36, %37 : vector<12x32xf32>
    %cst_36 = arith.constant dense<0.000000e+00> : vector<12xf32>
    %39 = vector.multi_reduction <add>, %38, %cst_36 [1] : vector<12x32xf32> to vector<12xf32>
    %40 = vector.shape_cast %39 : vector<12xf32> to vector<12x1xf32>
    %cst_37 = arith.constant 3.200000e+01 : f32
    %41 = vector.broadcast %cst_37 : f32 to vector<12x1xf32>
    %42 = arith.divf %40, %41 : vector<12x1xf32>
    %43 = vector.broadcast %42 : vector<12x1xf32> to vector<12x32xf32>
    %44 = arith.subf %38, %43 : vector<12x32xf32>
    %45 = arith.mulf %44, %44 : vector<12x32xf32>
    %cst_38 = arith.constant dense<0.000000e+00> : vector<12xf32>
    %46 = vector.multi_reduction <add>, %45, %cst_38 [1] : vector<12x32xf32> to vector<12xf32>
    %47 = vector.shape_cast %46 : vector<12xf32> to vector<12x1xf32>
    %cst_39 = arith.constant 3.200000e+01 : f32
    %48 = vector.broadcast %cst_39 : f32 to vector<12x1xf32>
    %49 = arith.divf %47, %48 : vector<12x1xf32>
    %50 = vector.broadcast %42 : vector<12x1xf32> to vector<12x32xf32>
    %51 = arith.subf %38, %50 : vector<12x32xf32>
    %cst_40 = arith.constant 9.99999974E-6 : f32
    %52 = vector.broadcast %cst_40 : f32 to vector<12x1xf32>
    %53 = arith.addf %49, %52 : vector<12x1xf32>
    %54 = math.rsqrt %53 : vector<12x1xf32>
    %55 = vector.broadcast %54 : vector<12x1xf32> to vector<12x32xf32>
    %56 = arith.mulf %51, %55 : vector<12x32xf32>
    %57 = vector.broadcast %30 : vector<1x32xf32> to vector<12x32xf32>
    %58 = arith.mulf %56, %57 : vector<12x32xf32>
    %59 = vector.broadcast %31 : vector<1x32xf32> to vector<12x32xf32>
    %60 = arith.addf %58, %59 : vector<12x32xf32>
    %cst_41 = arith.constant 0.000000e+00 : f32
    %61 = vector.broadcast %cst_41 : f32 to vector<12x32xf32>
    %62 = arith.maximumf %60, %61 : vector<12x32xf32>
    %cst_42 = arith.constant dense<0.000000e+00> : vector<12x32xf32>
    %63 = tpu.matmul %62, %32, %cst_42 {dimension_numbers = #tpu.dot_dimension_numbers<[1], [0], [0], [1], [0, 0, 1, 1], [], []>} : vector<12x32xf32>, vector<32x32xf32>, vector<12x32xf32> -> vector<12x32xf32>
    %64 = vector.broadcast %33 : vector<1x32xf32> to vector<12x32xf32>
    %65 = arith.addf %63, %64 : vector<12x32xf32>
    %cst_43 = arith.constant dense<0.000000e+00> : vector<12x32xf32>
    %66 = tpu.matmul %26, %27, %cst_43 {dimension_numbers = #tpu.dot_dimension_numbers<[1], [0], [0], [1], [0, 0, 1, 1], [], []>} : vector<12x32xf32>, vector<32x32xf32>, vector<12x32xf32> -> vector<12x32xf32>
    %cst_44 = arith.constant dense<0.000000e+00> : vector<12x32xf32>
    %67 = tpu.matmul %25, %28, %cst_44 {dimension_numbers = #tpu.dot_dimension_numbers<[1], [0], [0], [1], [0, 0, 1, 1], [], []>} : vector<12x32xf32>, vector<32x32xf32>, vector<12x32xf32> -> vector<12x32xf32>
    %68 = arith.addf %66, %67 : vector<12x32xf32>
    %69 = vector.broadcast %29 : vector<1x32xf32> to vector<12x32xf32>
    %70 = arith.addf %68, %69 : vector<12x32xf32>
    %cst_45 = arith.constant dense<0.000000e+00> : vector<12xf32>
    %71 = vector.multi_reduction <add>, %70, %cst_45 [1] : vector<12x32xf32> to vector<12xf32>
    %72 = vector.shape_cast %71 : vector<12xf32> to vector<12x1xf32>
    %cst_46 = arith.constant 3.200000e+01 : f32
    %73 = vector.broadcast %cst_46 : f32 to vector<12x1xf32>
    %74 = arith.divf %72, %73 : vector<12x1xf32>
    %75 = vector.broadcast %74 : vector<12x1xf32> to vector<12x32xf32>
    %76 = arith.subf %70, %75 : vector<12x32xf32>
    %77 = arith.mulf %76, %76 : vector<12x32xf32>
    %cst_47 = arith.constant dense<0.000000e+00> : vector<12xf32>
    %78 = vector.multi_reduction <add>, %77, %cst_47 [1] : vector<12x32xf32> to vector<12xf32>
    %79 = vector.shape_cast %78 : vector<12xf32> to vector<12x1xf32>
    %cst_48 = arith.constant 3.200000e+01 : f32
    %80 = vector.broadcast %cst_48 : f32 to vector<12x1xf32>
    %81 = arith.divf %79, %80 : vector<12x1xf32>
    %82 = vector.broadcast %74 : vector<12x1xf32> to vector<12x32xf32>
    %83 = arith.subf %70, %82 : vector<12x32xf32>
    %cst_49 = arith.constant 9.99999974E-6 : f32
    %84 = vector.broadcast %cst_49 : f32 to vector<12x1xf32>
    %85 = arith.addf %81, %84 : vector<12x1xf32>
    %86 = math.rsqrt %85 : vector<12x1xf32>
    %87 = vector.broadcast %86 : vector<12x1xf32> to vector<12x32xf32>
    %88 = arith.mulf %83, %87 : vector<12x32xf32>
    %89 = vector.broadcast %30 : vector<1x32xf32> to vector<12x32xf32>
    %90 = arith.mulf %88, %89 : vector<12x32xf32>
    %91 = vector.broadcast %31 : vector<1x32xf32> to vector<12x32xf32>
    %92 = arith.addf %90, %91 : vector<12x32xf32>
    %cst_50 = arith.constant 0.000000e+00 : f32
    %93 = vector.broadcast %cst_50 : f32 to vector<12x32xf32>
    %94 = arith.maximumf %92, %93 : vector<12x32xf32>
    %cst_51 = arith.constant dense<0.000000e+00> : vector<12x32xf32>
    %95 = tpu.matmul %94, %32, %cst_51 {dimension_numbers = #tpu.dot_dimension_numbers<[1], [0], [0], [1], [0, 0, 1, 1], [], []>} : vector<12x32xf32>, vector<32x32xf32>, vector<12x32xf32> -> vector<12x32xf32>
    %96 = vector.broadcast %33 : vector<1x32xf32> to vector<12x32xf32>
    %97 = arith.addf %95, %96 : vector<12x32xf32>
    %c0_52 = arith.constant 0 : index
    %c0_53 = arith.constant 0 : index
    %98 = vector.load %arg5[%c0_52, %c0_53] : memref<3x24xf32, #tpu.memory_space<vmem>>, vector<3x24xf32>
    %cst_54 = arith.constant dense<0.000000e+00> : vector<3x32xf32>
    %99 = tpu.matmul %98, %0, %cst_54 {dimension_numbers = #tpu.dot_dimension_numbers<[1], [0], [0], [1], [0, 0, 1, 1], [], []>} : vector<3x24xf32>, vector<24x32xf32>, vector<3x32xf32> -> vector<3x32xf32>
    %c0_55 = arith.constant 0 : index
    %c0_56 = arith.constant 0 : index
    %100 = vector.load %arg6[%c0_55, %c0_56] : memref<1x3xf32, #tpu.memory_space<vmem>>, vector<1x3xf32>
    %cst_57 = arith.constant dense<0.000000e+00> : vector<1x32xf32>
    %101 = tpu.matmul %100, %99, %cst_57 {dimension_numbers = #tpu.dot_dimension_numbers<[1], [0], [0], [1], [0, 0, 1, 1], [], []>} : vector<1x3xf32>, vector<3x32xf32>, vector<1x32xf32> -> vector<1x32xf32>
    %cst_58 = arith.constant dense<0.000000e+00> : vector<3x32xf32>
    %102 = tpu.matmul %4, %97, %cst_58 {dimension_numbers = #tpu.dot_dimension_numbers<[0], [0], [1], [1], [0, 1, 1, 1], [], []>} : vector<12x3xf32>, vector<12x32xf32>, vector<3x32xf32> -> vector<3x32xf32>
    %103 = vector.broadcast %101 : vector<1x32xf32> to vector<3x32xf32>
    %104 = arith.addf %102, %103 : vector<3x32xf32>
    %cst_59 = arith.constant dense<0.000000e+00> : vector<3x32xf32>
    %105 = tpu.matmul %3, %65, %cst_59 {dimension_numbers = #tpu.dot_dimension_numbers<[0], [0], [1], [1], [0, 1, 1, 1], [], []>} : vector<12x3xf32>, vector<12x32xf32>, vector<3x32xf32> -> vector<3x32xf32>
    %106 = arith.addf %99, %105 : vector<3x32xf32>
    %107 = arith.mulf %104, %104 : vector<3x32xf32>
    %cst_60 = arith.constant dense<0.000000e+00> : vector<3xf32>
    %108 = vector.multi_reduction <add>, %107, %cst_60 [1] : vector<3x32xf32> to vector<3xf32>
    %109 = vector.shape_cast %108 : vector<3xf32> to vector<3x1xf32>
    %110 = math.sqrt %109 : vector<3x1xf32>
    %cst_61 = arith.constant 9.99999996E-13 : f32
    %111 = vector.broadcast %cst_61 : f32 to vector<3x1xf32>
    %112 = arith.maximumf %110, %111 : vector<3x1xf32>
    %113 = vector.broadcast %112 : vector<3x1xf32> to vector<3x32xf32>
    %114 = arith.divf %104, %113 : vector<3x32xf32>
    %115 = arith.mulf %106, %106 : vector<3x32xf32>
    %cst_62 = arith.constant dense<0.000000e+00> : vector<3xf32>
    %116 = vector.multi_reduction <add>, %115, %cst_62 [1] : vector<3x32xf32> to vector<3xf32>
    %117 = vector.shape_cast %116 : vector<3xf32> to vector<3x1xf32>
    %118 = math.sqrt %117 : vector<3x1xf32>
    %cst_63 = arith.constant 9.99999996E-13 : f32
    %119 = vector.broadcast %cst_63 : f32 to vector<3x1xf32>
    %120 = arith.maximumf %118, %119 : vector<3x1xf32>
    %121 = vector.broadcast %120 : vector<3x1xf32> to vector<3x32xf32>
    %122 = arith.divf %106, %121 : vector<3x32xf32>
    %123 = arith.mulf %114, %122 : vector<3x32xf32>
    %cst_64 = arith.constant dense<0.000000e+00> : vector<3xf32>
    %124 = vector.multi_reduction <add>, %123, %cst_64 [1] : vector<3x32xf32> to vector<3xf32>
    %125 = vector.shape_cast %124 : vector<3xf32> to vector<3x1xf32>
    %c0_65 = arith.constant 0 : index
    %c0_66 = arith.constant 0 : index
    %126 = vector.load %arg16[%c0_65, %c0_66] : memref<3x1xf32, #tpu.memory_space<vmem>>, vector<3x1xf32>
    tpu.vector_store %arg16[%c0_65, %c0_66], %125 {strides = array<i32>} : memref<3x1xf32, #tpu.memory_space<vmem>>, vector<3x1xf32>,
    return
  }
  func.func @transform_0(%arg0: i32) -> (i32, i32) {
    %c0_i32 = arith.constant 0 : i32
    %c0_i32_0 = arith.constant 0 : i32
    %c0_i32_1 = arith.constant 0 : i32
    return %c0_i32, %c0_i32_0 : i32, i32
  }
  func.func @transform_1(%arg0: i32) -> (i32, i32) {
    %c0_i32 = arith.constant 0 : i32
    %c0_i32_0 = arith.constant 0 : i32
    %c0_i32_1 = arith.constant 0 : i32
    return %c0_i32, %c0_i32_0 : i32, i32
  }
  func.func @transform_2(%arg0: i32) -> (i32, i32) {
    %c0_i32 = arith.constant 0 : i32
    %c0_i32_0 = arith.constant 0 : i32
    %c0_i32_1 = arith.constant 0 : i32
    return %c0_i32, %c0_i32_0 : i32, i32
  }
  func.func @transform_3(%arg0: i32) -> (i32, i32) {
    %c0_i32 = arith.constant 0 : i32
    %c0_i32_0 = arith.constant 0 : i32
    %c0_i32_1 = arith.constant 0 : i32
    return %c0_i32, %c0_i32_0 : i32, i32
  }
  func.func @transform_4(%arg0: i32) -> (i32, i32) {
    %c0_i32 = arith.constant 0 : i32
    %c0_i32_0 = arith.constant 0 : i32
    %c0_i32_1 = arith.constant 0 : i32
    return %c0_i32, %c0_i32_0 : i32, i32
  }
  func.func @transform_5(%arg0: i32) -> (i32, i32) {
    %c0_i32 = arith.constant 0 : i32
    %c0_i32_0 = arith.constant 0 : i32
    %c0_i32_1 = arith.constant 0 : i32
    return %c0_i32, %c0_i32_0 : i32, i32
  }
  func.func @transform_6(%arg0: i32) -> (i32, i32) {
    %c0_i32 = arith.constant 0 : i32
    %c0_i32_0 = arith.constant 0 : i32
    %c0_i32_1 = arith.constant 0 : i32
    return %c0_i32, %c0_i32_0 : i32, i32
  }
  func.func @transform_7(%arg0: i32) -> (i32, i32) {
    %c0_i32 = arith.constant 0 : i32
    %c0_i32_0 = arith.constant 0 : i32
    %c0_i32_1 = arith.constant 0 : i32
    return %c0_i32, %c0_i32_0 : i32, i32
  }
  func.func @transform_8(%arg0: i32) -> (i32, i32) {
    %c0_i32 = arith.constant 0 : i32
    %c0_i32_0 = arith.constant 0 : i32
    %c0_i32_1 = arith.constant 0 : i32
    return %c0_i32, %c0_i32_0 : i32, i32
  }
  func.func @transform_9(%arg0: i32) -> (i32, i32) {
    %c0_i32 = arith.constant 0 : i32
    %c0_i32_0 = arith.constant 0 : i32
    %c0_i32_1 = arith.constant 0 : i32
    return %c0_i32, %c0_i32_0 : i32, i32
  }
  func.func @transform_10(%arg0: i32) -> (i32, i32) {
    %c0_i32 = arith.constant 0 : i32
    %c0_i32_0 = arith.constant 0 : i32
    %c0_i32_1 = arith.constant 0 : i32
    return %c0_i32, %c0_i32_0 : i32, i32
  }
  func.func @transform_11(%arg0: i32) -> (i32, i32) {
    %c0_i32 = arith.constant 0 : i32
    %c0_i32_0 = arith.constant 0 : i32
    %c0_i32_1 = arith.constant 0 : i32
    return %c0_i32, %c0_i32_0 : i32, i32
  }
  func.func @transform_12(%arg0: i32) -> (i32, i32) {
    %c0_i32 = arith.constant 0 : i32
    %c0_i32_0 = arith.constant 0 : i32
    %c0_i32_1 = arith.constant 0 : i32
    return %c0_i32, %c0_i32_0 : i32, i32
  }
  func.func @transform_13(%arg0: i32) -> (i32, i32) {
    %c0_i32 = arith.constant 0 : i32
    %c0_i32_0 = arith.constant 0 : i32
    %c0_i32_1 = arith.constant 0 : i32
    return %c0_i32, %c0_i32_0 : i32, i32
  }
  func.func @transform_14(%arg0: i32) -> (i32, i32) {
    %c0_i32 = arith.constant 0 : i32
    %c0_i32_0 = arith.constant 0 : i32
    %c0_i32_1 = arith.constant 0 : i32
    return %c0_i32, %c0_i32_0 : i32, i32
  }
  func.func @transform_15(%arg0: i32) -> (i32, i32) {
    %c0_i32 = arith.constant 0 : i32
    %c0_i32_0 = arith.constant 0 : i32
    %c0_i32_1 = arith.constant 0 : i32
    return %c0_i32, %c0_i32_0 : i32, i32
  }
}

</mosaic_0001>

<bundles_post_ra>
// kernel: tpu_custom_call.1
= control target key start
LH: loop header
LB: loop body
LE: loop exit
PB: predicated region body
PF: predicated region fallthrough
CT: control target
= control target key end

     0   :  { %20 = vsyncpa [#allocation3], 0  ;;  %s2735_s0 = inlined_call_operand.hbm [shape: f32[24,32], index: 0, kind: input, shape index: {}]   ;;  %s2736_s1 = inlined_call_operand.hbm [shape: f32[12,32], index: 1, kind: input, shape index: {}]   ;;  %s2737_s2 = inlined_call_operand.hbm [shape: f32[4,32], index: 2, kind: input, shape index: {}]   ;;  %s2738_s3 = inlined_call_operand.vmem [shape: f32[12,3], index: 3, kind: input, shape index: {}]   ;;  %s2739_s4 = inlined_call_operand.hbm [shape: f32[3,24], index: 4, kind: input, shape index: {}]   ;;  %s2740_s5 = inlined_call_operand.vmem [shape: f32[1,3], index: 5, kind: input, shape index: {}]   ;;  %s2741_s6 = inlined_call_operand.vmem [shape: f32[12,3], index: 6, kind: input, shape index: {}]   ;;  %s2742_s7 = inlined_call_operand.vmem [shape: f32[12,4], index: 7, kind: input, shape index: {}]   ;;  %s2743_s8 = inlined_call_operand.vmem [shape: f32[32,32], index: 8, kind: input, shape index: {}]   ;;  %s2744_s9 = inlined_call_operand.vmem [shape: f32[32,32], index: 9, kind: input, shape index: {}]   ;;  %s2745_s10 = inlined_call_operand.hbm [shape: f32[1,32], index: 10, kind: input, shape index: {}]   ;;  %s2746_s11 = inlined_call_operand.vmem [shape: f32[1,32], index: 11, kind: input, shape index: {}]   ;;  %s2747_s12 = inlined_call_operand.vmem [shape: f32[1,32], index: 12, kind: input, shape index: {}]   ;;  %s2748_s13 = inlined_call_operand.vmem [shape: f32[32,32], index: 13, kind: input, shape index: {}]   ;;  %s2749_s14 = inlined_call_operand.vmem [shape: f32[1,32], index: 14, kind: input, shape index: {}]   ;;  %s2750_s15 = inlined_call_operand.vmem [shape: f32[3,1], index: 15, kind: output, shape index: {}]  }
   0x1   :  { %21 = vsyncpa [#allocation5], 0 }
   0x2   :  { %22 = vsyncpa [#allocation8], 0  ;;  %s2328_s18 = smov [#allocation4]   ;;  %s2329_s20 = smov [#allocation7]  }
   0x3   :  { %s40_s19 = sshll.u32 %s2328_s18, 4  ;;  %s65_s21 = sshll.u32 %s2329_s20, 4  ;;  %s41_s19 = int_to_ptr.vmem [resolvable:$true] %s40_s19  ;;  %s66_s21 = int_to_ptr.vmem [resolvable:$true] %s65_s21 }
   0x4   :  { %s2212_s24 = scalar_lea.hbm %s2736_s1, 256 }
   0x5   :  { %p2213_p0 = scmp.ne.s32.totalorder %s2736_s1, %s2212_s24  ;;  %p2216_p1 = scmp.lt.u32.totalorder %s2212_s24, %s2736_s1 }
   0x7   :  { %p2218_p2 = pnand %p2216_p1, %p2213_p0 }
   0x9   :  { %2221 = shalt.err (!%p2218_p2)
}
   0xa   :  { %s2222_s29 = scalar_lea.vmem %s41_s19, 256  ;;  %p2227_p4 = scmp.lt.s32.totalorder %s41_s19, %s41_s19 }
   0xb   :  { %p2223_p3 = scmp.ne.s32.totalorder %s41_s19, %s2222_s29  ;;  %p2228_p5 = scmp.lt.s32.totalorder %s2222_s29, %s2222_s29 }
   0xd   :  { %p2229_p6 = por %p2228_p5, %p2227_p4 }
   0xf   :  { %p2230_p7 = pnand %p2229_p6, %p2223_p3 }
  0x11   :  { %2233 = shalt.err (!%p2230_p7)
}
  0x12   :  { %s2330_s30 = smov 128   ;;  %s2331_s16 = smov 8  }
  0x13   :  { %46 = dma.hbm_to_vmem [thread:$0]  %s2736_s1, 256, %s41_s19, [#allocation5], %s2330_s30, %s2330_s30, %s2331_s16  }
  0x14   :  { %s2234_s23 = scalar_lea.hbm %s2739_s4, 64 }
  0x15   :  { %p2235_p8 = scmp.ne.s32.totalorder %s2739_s4, %s2234_s23  ;;  %p2238_p9 = scmp.lt.u32.totalorder %s2234_s23, %s2739_s4 }
  0x17   :  { %p2240_p10 = pnand %p2238_p9, %p2235_p8 }
  0x19   :  { %2243 = shalt.err (!%p2240_p10)
}
  0x1a   :  { %s2244_s28 = scalar_lea.vmem %s66_s21, 64  ;;  %p2249_p12 = scmp.lt.s32.totalorder %s66_s21, %s66_s21 }
  0x1b   :  { %p2245_p11 = scmp.ne.s32.totalorder %s66_s21, %s2244_s28  ;;  %p2250_p13 = scmp.lt.s32.totalorder %s2244_s28, %s2244_s28 }
  0x1d   :  { %p2251_p0 = por %p2250_p13, %p2249_p12 }
  0x1f   :  { %p2252_p1 = pnand %p2251_p0, %p2245_p11 }
  0x21   :  { %2255 = shalt.err (!%p2252_p1)
}
  0x22   :  { %68 = dma.hbm_to_vmem [thread:$0]  %s2739_s4, 64, %s66_s21, [#allocation8]  }
  0x23   :  { %s2332_s29 = smov [#allocation2]   ;;  %s2333_s18 = smov [#allocation6]  }
  0x24   :  { %s28_s17 = sshll.u32 %s2332_s29, 4  ;;  %s53_s20 = sshll.u32 %s2333_s18, 4  ;;  %s29_s17 = int_to_ptr.vmem [resolvable:$true] %s28_s17  ;;  %s54_s20 = int_to_ptr.vmem [resolvable:$true] %s53_s20 }
  0x25   :  { %s2256_s24 = scalar_lea.hbm %s2735_s0, 384 }
  0x26   :  { %p2257_p2 = scmp.ne.s32.totalorder %s2735_s0, %s2256_s24  ;;  %p2260_p3 = scmp.lt.u32.totalorder %s2256_s24, %s2735_s0 }
  0x28   :  { %p2262_p4 = pnand %p2260_p3, %p2257_p2 }
  0x2a   :  { %2265 = shalt.err (!%p2262_p4)
}
  0x2b   :  { %s2266_s4 = scalar_lea.vmem %s29_s17, 384  ;;  %p2271_p6 = scmp.lt.s32.totalorder %s29_s17, %s29_s17 }
  0x2c   :  { %p2267_p5 = scmp.ne.s32.totalorder %s29_s17, %s2266_s4  ;;  %p2272_p7 = scmp.lt.s32.totalorder %s2266_s4, %s2266_s4 }
  0x2e   :  { %p2273_p8 = por %p2272_p7, %p2271_p6 }
  0x30   :  { %p2274_p9 = pnand %p2273_p8, %p2267_p5 }
  0x32   :  { %2277 = shalt.err (!%p2274_p9)
}
  0x33   :  { %34 = dma.hbm_to_vmem [thread:$0]  %s2735_s0, 384, %s29_s17, [#allocation3], %s2330_s30, %s2330_s30, %s2331_s16  }
  0x34   :  { %s2278_s18 = scalar_lea.hbm %s2737_s2, 64 }
  0x35   :  { %p2279_p10 = scmp.ne.s32.totalorder %s2737_s2, %s2278_s18  ;;  %p2282_p11 = scmp.lt.u32.totalorder %s2278_s18, %s2737_s2 }
  0x37   :  { %p2284_p12 = pnand %p2282_p11, %p2279_p10 }
  0x39   :  { %2287 = shalt.err (!%p2284_p12)
}
  0x3a   :  { %s2288_s26 = scalar_lea.vmem %s54_s20, 64  ;;  %p2293_p0 = scmp.lt.s32.totalorder %s54_s20, %s54_s20 }
  0x3b   :  { %p2289_p13 = scmp.ne.s32.totalorder %s54_s20, %s2288_s26  ;;  %p2294_p1 = scmp.lt.s32.totalorder %s2288_s26, %s2288_s26 }
  0x3d   :  { %p2295_p2 = por %p2294_p1, %p2293_p0 }
  0x3f   :  { %p2296_p3 = pnand %p2295_p2, %p2289_p13 }
  0x41   :  { %2299 = shalt.err (!%p2296_p3)
}
  0x42   :  { %56 = dma.hbm_to_vmem [thread:$0]  %s2737_s2, 64, %s54_s20, [#allocation5]  }
  0x43   :  { %s2334_s16 = smov [#allocation9]   ;;  %s2300_s4 = scalar_lea.hbm %s2745_s10, 16 }
  0x44   :  { %s85_s17 = sshll.u32 %s2334_s16, 4  ;;  %p2301_p4 = scmp.ne.s32.totalorder %s2745_s10, %s2300_s4  ;;  %s86_s17 = int_to_ptr.vmem [resolvable:$true] %s85_s17 }
  0x45   :  { %p2304_p5 = scmp.lt.u32.totalorder %s2300_s4, %s2745_s10 }
  0x47   :  { %p2306_p6 = pnand %p2304_p5, %p2301_p4 }
  0x49   :  { %2309 = shalt.err (!%p2306_p6)
}
  0x4a   :  { %s2310_s18 = scalar_lea.vmem %s86_s17, 16  ;;  %s2314_s2 = scalar_lea.vmem %s86_s17, 32 }
  0x4b   :  { %p2311_p7 = scmp.ne.s32.totalorder %s86_s17, %s2310_s18  ;;  %p2315_p8 = scmp.lt.s32.totalorder %s86_s17, %s86_s17 }
  0x4c   :  { %p2316_p9 = scmp.lt.s32.totalorder %s2314_s2, %s2310_s18 }
  0x4e   :  { %p2317_p10 = por %p2316_p9, %p2315_p8 }
  0x50   :  { %p2318_p11 = pnand %p2317_p10, %p2311_p7 }
  0x52   :  { %2321 = shalt.err (!%p2318_p11)
}
  0x53   :  { %88 = dma.hbm_to_vmem [thread:$0]  %s2745_s10, 16, %s86_s17, [#allocation8]  }
  0x54   :  { %2322 = dma.done.wait [#allocation3], 384  }
  0x55   :  { %2323 = vsyncadd [#allocation3], 4294966912 }
  0x56   :  { %2324 = dma.done.wait [#allocation5], 320  }
  0x57   :  { %2325 = vsyncadd [#allocation5], 4294966976 }
  0x58   :  { %2326 = dma.done.wait [#allocation8], 80  }
  0x59   :  { %2327 = vsyncadd [#allocation8], 4294967216  ;;  %vm124_vm0 = vcmask 261120   ;;  %v2485_v0 = vld [vmem:[#allocation6] sm:$0xf]  ;;  %v2487_v1 = vld [vmem:[#allocation4] sm:$0xff] }
  0x5a   :  { %1944 = vmatprep.subr.msk.mxu0 %vm124_vm0, %v2485_v0  ;;  %1946 = vmatprep.mubr.msk.f32.mxu0 %vm124_vm0, %v2487_v1  ;;  %v2495_v2 = vld [vmem:[#allocation4 + $0x8] sm:$0xf]  ;;  %vm211_vm1 = vcmask 27648   ;;  %vm209_vm2 = vcmask 31744   ;;  %v119_v9 = vld [vmem:[%s2738_s3 + $0x8] sm:$0xf] }
  0x5b   :  { %1945 = vmatpush3.xpose.msk.msra.mxu0 %vm124_vm0, %v2485_v0  ;;  %v118_v8 = vld [vmem:[%s2738_s3] sm:$0xff]  ;;  %v2335_v10 = vmov 0.0|0.0   ;;  %vm2336_vm3 = vmmov 0   ;;  %v2337_v11 = vmov 0.0   ;;  %vm266_vm4 = vcmask 1043456   ;;  %vm2530_vm9 = vmpackc.low %vm209_vm2, %vm209_vm2  ;;  %v856_v56 = vld [vmem:[%s2744_s9 + $0x8] sm:$0xff] }
  0x5c   :  { %2086 = vmatprep.subr.bf16.mxu1 %v2335_v10  ;;  %1953 = vmatprep.mubr.msk.f32.mxu1 %vm2336_vm3, %v2337_v11  ;;  %vm2338_vm5 = vmmov 1   ;;  %vm262_vm7 = vcmask 97280   ;;  %vm340_vm8 = vcmask 23552   ;;  %vm347_vm10 = vcmask 1042432   ;;  %v2548_v43 = vld [vmem:[%s2741_s6] sm:$0xff]  ;;  %v857_v61 = vld [vmem:[%s2744_s9 + $0x10] sm:$0xff] }
  0x5d   :  { %vm2512_vm6 = vmpackc.low %vm266_vm4, %vm2338_vm5  ;;  %v2090_v41 = vpack.c.bf16 %v119_v9, %v118_v8  ;;  %v2102_v42 = vpack.c.bf16 %v2495_v2, %v2487_v1  ;;  %v2555_v44 = vld [vmem:[%s2741_s6 + $0x8] sm:$0xf]  ;;  %v122_v51 = vld [vmem:[%s2742_s7] sm:$0xff]  ;;  %vm1034_vm12 = vcmask 257024   ;;  %vm1442_vm13 = vcmask 195584  }
  0x5e   :  { %1947 = vmatmul.mubr.msk.f32.vlgmr.msra.gmra.mrb[0].mxu0 %vm124_vm0, %v2495_v2  ;;  %vm2091_vm11 = vmpackc.low %vm340_vm8, %vm340_vm8  ;;  %v123_v52 = vld [vmem:[%s2742_s7 + $0x8] sm:$0xf]  ;;  %v855_v55 = vld [vmem:[%s2744_s9] sm:$0xff]  ;;  %vm1780_vm14 = vcmask 256000  }
  0x5f   :  { %1958 = vmatprep.mubr.msk.f32.mxu0 %vm340_vm8, %v118_v8  ;;  %v2585_v57 = vpack.c.bf16 %v856_v56, %v855_v55  ;;  %v858_v62 = vld [vmem:[%s2744_s9 + $0x18] sm:$0xff] }
 0x131   :  { %v1948_v3 = vpop.f32.mrb[0].mxu0 }
 0x132   :  { %v200_v4 = vpop.f32.mrb[1].mxu0  ;;  %v212_v5 = vsel %vm211_vm1, %v1948_v3, -inf }
 0x133   :  { %v210_v6 = vsel %vm209_vm2, %v200_v4, -inf }
 0x134   :  { %v213_v7 = vmax.f32 %v210_v6, %v212_v5  ;;  %v851_v5 = vld [vmem:[%s2743_s8] sm:$0xff]  ;;  %v852_v6 = vld [vmem:[%s2743_s8 + $0x8] sm:$0xff] }
 0x136   :  { %214 = vmax.xlane.f32.xlu0 %v213_v7  ;;  %v2607_v7 = vpack.c.bf16 %v852_v6, %v851_v5 }
 0x163   :  { %230 = vxpose.xlu0.b32.start [1/2] (short) (narrow) %v118_v8, 8  ;;  %v853_v8 = vld [vmem:[%s2743_s8 + $0x10] sm:$0xff] }
 0x167   :  { %231 = vxpose.xlu0.b32.end [2/2] (short) (narrow) %v119_v9, 8 }
 0x1c3   :  { %v215_v12 = vpop.xlane.xlu0 %214 }
 0x1c4   :  { %v216_v13 = vrot.slane %v215_v12, 4 }
 0x1c6   :  { %v217_v14 = vmax.f32 %v215_v12, %v216_v13 }
 0x1c8   :  { %v218_v15 = vrot.slane %v217_v14, 2 }
 0x1ca   :  { %v219_v16 = vmax.f32 %v217_v14, %v218_v15  ;;  %v2631_v15 = vld [vmem:[#allocation9] ss:$0 sm:$0xff] }
 0x1cc   :  { %v220_v17 = vrot.slane %v219_v16, 1 }
 0x1ce   :  { %v221_v18 = vmax.f32 %v219_v16, %v220_v17 }
 0x1d0   :  { %2171 = vpush %v221_v18 }
 0x1e3   :  { %v2518_v29 = vpop.trf.xlu0 }
 0x201   :  { %s2172_s26 = spop %2171 }
 0x202   :  { %v223_v19 = vstv %s2172_s26 }
 0x203   :  { %v224_v20 = vsub.f32 %v200_v4, %v223_v19  ;;  %v225_v21 = vsub.f32 %v1948_v3, %v223_v19  ;;  %v2594_v4 = vpack.c.bf16 %v858_v62, %v857_v61 }
 0x205   :  { %v226_v22 = vmul.f32 1.442695, %v224_v20  ;;  %v228_v23 = vmul.f32 1.442695, %v225_v21 }
 0x207   :  { %2184 = vpow2.f32 %v226_v22 }
 0x208   :  { %2186 = vpow2.f32 %v228_v23 }
 0x211   :  { %v2185_v24 = vpop.eup %2184 }
 0x212   :  { %v2187_v25 = vpop.eup %2186  ;;  %v513_v26 = vsel %vm209_vm2, %v2185_v24, 0.0 }
 0x213   :  { %514 = vadd.xlane.f32.xlu1 %v513_v26  ;;  %v2087_v28 = vpack.c.bf16 %v2187_v25, %v2185_v24  ;;  %v516_v30 = vsel %vm211_vm1, %v2187_v25, 0.0 }
 0x215   :  { %2089 = vmatpush3.bf16.msk.msra.mxu1 %vm2512_vm6, %v2087_v28 }
 0x216   :  { %1961 = vmatprep.subr.msk.mxu1 %vm266_vm4, %v2485_v0 }
 0x217   :  { %517 = vadd.xlane.f32.xlu1 %v516_v30 }
 0x218   :  { %1954 = vmatmul.mubr.msk.f32.vlgmr.msra.gmra.mrb[0].mxu1 %vm262_vm7, %v2518_v29 }
 0x219   :  { %1962 = vmatpush3.msk.msra.mxu1 %vm266_vm4, %v2485_v0 }
 0x2a0   :  { %v515_v31 = vpop.xlane.xlu1 %514 }
 0x2a1   :  { %2188 = vrcp.f32 %v515_v31 }
 0x2a4   :  { %v518_v32 = vpop.xlane.xlu1 %517 }
 0x2a5   :  { %2190 = vrcp.f32 %v518_v32  ;;  %v862_v32 = vld [vmem:[%s2748_s13] sm:$0xff] }
 0x2ab   :  { %v2189_v33 = vpop.eup %2188 }
 0x2ac   :  { %v520_v35 = vmul.f32 %v2189_v33, %v2185_v24  ;;  %v863_v33 = vld [vmem:[%s2748_s13 + $0x8] sm:$0xff] }
 0x2af   :  { %v2191_v34 = vpop.eup %2190 }
 0x2b0   :  { %v522_v36 = vmul.f32 %v2191_v34, %v2187_v25  ;;  %v2124_v34 = vpack.c.bf16 %v863_v33, %v862_v32 }
 0x2b2   :  { %v2096_v38 = vpack.c.bf16 %v522_v36, %v520_v35  ;;  %v864_v35 = vld [vmem:[%s2748_s13 + $0x10] sm:$0xff]  ;;  %v865_v36 = vld [vmem:[%s2748_s13 + $0x18] sm:$0xff] }
 0x2b3   :  { %v2128_v37 = vpack.c.bf16 %v865_v36, %v864_v35  ;;  %v113_v35 = vld [vmem:[#allocation2 + $0x8] sm:$0xff] }
 0x2b4   :  { %2098 = vmatprep.subr.msk.bf16.mxu1 %vm2530_vm9, %v2096_v38 }
 0x2eb   :  { %v336_v39 = vpop.f32.mrb[0].mxu1 }
 0x2ec   :  { %v1955_v40 = vpop.f32.mrb[1].mxu1  ;;  %1956 = vmatprep.subr.msk.mxu0 %vm347_vm10, %v336_v39 }
 0x2ed   :  { %1957 = vmatpush3.msk.msra.mxu0 %vm347_vm10, %v336_v39 }
 0x2ee   :  { %1959 = vmatmul.mubr.msk.f32.vlgmr.msra.gmra.mrb[2].mxu0 %vm340_vm8, %v119_v9  ;;  %2092 = vmatprep.subr.msk.bf16.mxu0 %vm2091_vm11, %v2090_v41  ;;  %v854_v9 = vld [vmem:[%s2743_s8 + $0x18] sm:$0xff] }
 0x2ef   :  { %1970 = vmatprep.mubr.msk.f32.mxu0 %vm340_vm8, %v2548_v43  ;;  %v2617_v12 = vpack.c.bf16 %v854_v9, %v853_v8 }
 0x2f4   :  { %2095 = vmatpush3.bf16.xpose.msk.msra.mxu0 %vm2091_vm11, %v2090_v41 }
 0x2f5   :  { %2104 = vmatprep.subr.msk.bf16.mxu0 %vm2512_vm6, %v2102_v42 }
 0x2fb   :  { %1971 = vmatmul.mubr.msk.f32.vlgmr.msra.gmra.mrb[4].mxu0 %vm340_vm8, %v2555_v44 }
 0x2fc   :  { %2107 = vmatpush3.bf16.msk.msra.mxu0 %vm2512_vm6, %v2102_v42 }
 0x2fd   :  { %2109 = vmatprep.subr.bf16.mxu0 %v2585_v57 }
 0x3c1   :  { %v1960_v45 = vpop.f32.mrb[2].mxu0 }
 0x3c2   :  { %2192 = vrcp.f32 %v1960_v45  ;;  %v417_v46 = vpop.f32.mrb[3].mxu0 }
 0x3c3   :  { %2194 = vrcp.f32 %v417_v46 }
 0x3cc   :  { %v2193_v47 = vpop.eup %2192 }
 0x3cd   :  { %v2195_v48 = vpop.eup %2194  ;;  %v429_v50 = vmul.f32 %v2193_v47, %v2187_v25 }
 0x3ce   :  { %v427_v49 = vmul.f32 %v2195_v48, %v2185_v24  ;;  %v1972_v53 = vpop.f32.mrb[4].mxu0 }
 0x3cf   :  { %v595_v54 = vpop.f32.mrb[5].mxu0 }
 0x3d0   :  { %1963 = vmatprep.mubr.msk.f32.mxu1 %vm209_vm2, %v427_v49  ;;  %v2656_v49 = vld [vmem:[%s2746_s11] ss:$0 sm:$0xff] }
 0x3d1   :  { %1964 = vmatmul.mubr.msk.f32.vlgmr.msra.gmra.mrb[2].mxu1 %vm209_vm2, %v429_v50 }
 0x3d2   :  { %2101 = vmatpush3.bf16.xpose.msk.msra.mxu1 %vm2530_vm9, %v2096_v38  ;;  %1977 = vmatprep.mubr.msk.f32.mxu1 %vm209_vm2, %v122_v51 }
 0x3d3   :  { %1987 = vmatprep.subr.msk.mxu1 %vm266_vm4, %v2485_v0 }
 0x3d9   :  { %1978 = vmatmul.mubr.msk.f32.vlgmr.msra.gmra.mrb[4].mxu1 %vm209_vm2, %v123_v52 }
 0x3da   :  { %1988 = vmatpush3.msk.msra.mxu1 %vm266_vm4, %v2485_v0  ;;  %1989 = vmatprep.mubr.msk.f32.mxu1 %vm209_vm2, %v122_v51  ;;  %v2661_v51 = vld [vmem:[%s2747_s12] ss:$0 sm:$0xff] }
 0x3db   :  { %2125 = vmatprep.subr.bf16.mxu1 %v2124_v34 }
 0x3dd   :  { %1990 = vmatmul.mubr.msk.f32.vlgmr.msra.gmra.mrb[6].mxu1 %vm209_vm2, %v123_v52 }
 0x3de   :  { %2127 = vmatpush3.bf16.msra.mxu1 %v2124_v34 }
 0x3df   :  { %2129 = vmatprep.subr.bf16.mxu1 %v2128_v37 }
 0x3e2   :  { %2131 = vmatpush3.bf16.msra.mxu1 %v2128_v37 }
 0x3e3   :  { %2133 = vmatprep.subr.bf16.mxu1 %v2585_v57 }
 0x4a4   :  { %v1965_v58 = vpop.f32.mrb[2].mxu1 }
 0x4a5   :  { %v504_v59 = vpop.f32.mrb[3].mxu1 }
 0x4ac   :  { %v1979_v60 = vpop.f32.mrb[4].mxu1 }
 0x4ad   :  { %v692_v63 = vmul.f32 %v1979_v60, %v1972_v53  ;;  %v682_v0 = vpop.f32.mrb[5].mxu1 }
 0x4ae   :  { %v691_v3 = vmul.f32 %v682_v0, %v595_v54 }
 0x4b0   :  { %1984 = vmatprep.mubr.msk.f32.mxu0 %vm262_vm7, %v691_v3  ;;  %v1991_v38 = vpop.f32.mrb[6].mxu1 }
 0x4b1   :  { %1985 = vmatmul.mubr.msk.f32.vlgmr.msra.gmra.mrb[6].mxu0 %vm262_vm7, %v692_v63  ;;  %v842_v39 = vpop.f32.mrb[7].mxu1 }
 0x4b2   :  { %2111 = vmatpush3.bf16.msra.mxu0 %v2585_v57  ;;  %2000 = vmatprep.mubr.msk.f32.mxu0 %vm124_vm0, %v504_v59 }
 0x4b3   :  { %2113 = vmatprep.subr.bf16.mxu0 %v2594_v4 }
 0x4b6   :  { %2115 = vmatpush3.bf16.msra.mxu0 %v2594_v4 }
 0x4b7   :  { %2117 = vmatprep.subr.bf16.mxu0 %v2607_v7 }
 0x4b9   :  { %2001 = vmatmul.mubr.msk.f32.vlgmr.msra.gmra.mrb[8].mxu0 %vm124_vm0, %v1965_v58 }
 0x4ba   :  { %2119 = vmatpush3.bf16.msra.mxu0 %v2607_v7  ;;  %2011 = vmatprep.mubr.msk.f32.mxu0 %vm124_vm0, %v2487_v1 }
 0x4bb   :  { %2121 = vmatprep.subr.bf16.mxu0 %v2617_v12 }
 0x4be   :  { %2123 = vmatpush3.bf16.msra.mxu0 %v2617_v12 }
 0x4bf   :  { %2149 = vmatprep.subr.bf16.mxu0 %v2124_v34 }
 0x4c1   :  { %2012 = vmatmul.mubr.msk.f32.vlgmr.msra.gmra.mrb[8].mxu0 %vm124_vm0, %v2495_v2 }
 0x4c2   :  { %2151 = vmatpush3.bf16.msra.mxu0 %v2124_v34 }
 0x4c3   :  { %2153 = vmatprep.subr.bf16.mxu0 %v2128_v37 }
 0x4c6   :  { %2155 = vmatpush3.bf16.msra.mxu0 %v2128_v37 }
 0x4c7   :  { %2156 = vmatprep.subr.bf16.mxu0 %v2335_v10 }
 0x584   :  { %v2627_v13 = vpop.f32.mrb[6].mxu0 }
 0x585   :  { %v2629_v14 = vpop.f32.mrb[7].mxu0 }
 0x594   :  { %v2013_v16 = vpop.f32.mrb[8].mxu0 }
 0x595   :  { %v1014_v17 = vpop.f32.mrb[9].mxu0  ;;  %v1030_v19 = vadd.f32 %v2013_v16, %v2631_v15 }
 0x596   :  { %v1029_v18 = vadd.f32 %v2631_v15, %v1014_v17 }
 0x597   :  { %v1035_v20 = vsel %vm1034_vm12, %v1030_v19, 0.0 }
 0x598   :  { %v1031_v1 = vsel %vm124_vm0, %v1029_v18, 0.0 }
 0x599   :  { %1032 = vadd.xlane.f32.xlu1 %v1031_v1 }
 0x59d   :  { %1036 = vadd.xlane.f32.xlu1 %v1035_v20 }
 0x626   :  { %v1033_v2 = vpop.xlane.xlu1 %1032 }
 0x627   :  { %v1039_v21 = vmul.f32 0.03125, %v1033_v2 }
 0x629   :  { %v1041_v22 = vsub.f32 %v1029_v18, %v1039_v21 }
 0x62a   :  { %v1037_v23 = vpop.xlane.xlu1 %1036 }
 0x62b   :  { %v1040_v24 = vmul.f32 0.03125, %v1037_v23  ;;  %v1043_v25 = vmul.f32 %v1041_v22, %v1041_v22 }
 0x62d   :  { %v1042_v26 = vsub.f32 %v1030_v19, %v1040_v24  ;;  %v1045_v28 = vsel %vm124_vm0, %v1043_v25, 0.0 }
 0x62e   :  { %1046 = vadd.xlane.f32.xlu1 %v1045_v28 }
 0x62f   :  { %v1044_v30 = vmul.f32 %v1042_v26, %v1042_v26 }
 0x631   :  { %v1048_v31 = vsel %vm1034_vm12, %v1044_v30, 0.0 }
 0x632   :  { %1049 = vadd.xlane.f32.xlu1 %v1048_v31 }
 0x6bb   :  { %v1047_v40 = vpop.xlane.xlu1 %1046 }
 0x6bc   :  { %v1051_v41 = vmul.f32 0.03125, %v1047_v40  ;;  %v1441_v40 = vld [vmem:[#allocation7] sm:$0x7] }
 0x6be   :  { %v1053_v42 = vadd.f32 1e-05, %v1051_v41 }
 0x6bf   :  { %v1050_v45 = vpop.xlane.xlu1 %1049 }
 0x6c0   :  { %2196 = vrsqrt.f32 %v1053_v42  ;;  %v1052_v46 = vmul.f32 0.03125, %v1050_v45 }
 0x6c2   :  { %v1054_v47 = vadd.f32 1e-05, %v1052_v46 }
 0x6c4   :  { %2198 = vrsqrt.f32 %v1054_v47 }
 0x6ca   :  { %v2197_v48 = vpop.eup %2196 }
 0x6cb   :  { %v1057_v50 = vmul.f32 %v2197_v48, %v1041_v22  ;;  %v1516_v48 = vld [vmem:[%s2740_s5] sm:$0x1] }
 0x6cd   :  { %v1065_v52 = vmul.f32 %v2656_v49, %v1057_v50 }
 0x6ce   :  { %v2199_v53 = vpop.eup %2198 }
 0x6cf   :  { %v1058_v54 = vmul.f32 %v2199_v53, %v1042_v26  ;;  %v1073_v55 = vadd.f32 %v2661_v51, %v1065_v52 }
 0x6d1   :  { %v1075_v56 = vmax.f32 %v1073_v55, 0.0  ;;  %v1066_v58 = vmul.f32 %v2656_v49, %v1058_v54 }
 0x6d3   :  { %2022 = vmatprep.mubr.msk.f32.mxu1 %vm124_vm0, %v1075_v56  ;;  %v1074_v59 = vadd.f32 %v2661_v51, %v1066_v58  ;;  %v1593_v56 = vlaneseq }
 0x6d5   :  { %v1076_v60 = vmax.f32 %v1074_v59, 0.0  ;;  %v1594_v58 = vshrl.u32 %v1593_v56, 7 }
 0x6d7   :  { %2023 = vmatmul.mubr.msk.f32.vlgmr.msra.gmra.mrb[8].mxu1 %vm124_vm0, %v1076_v60 }
 0x6d8   :  { %2135 = vmatpush3.bf16.msra.mxu1 %v2585_v57  ;;  %2033 = vmatprep.mubr.msk.f32.mxu1 %vm124_vm0, %v2629_v14  ;;  %v2688_v57 = vld [vmem:[%s2749_s14] ss:$0 sm:$0xff] }
 0x6d9   :  { %2137 = vmatprep.subr.bf16.mxu1 %v2594_v4 }
 0x6dc   :  { %2139 = vmatpush3.bf16.msra.mxu1 %v2594_v4 }
 0x6dd   :  { %2141 = vmatprep.subr.bf16.mxu1 %v2607_v7 }
 0x6df   :  { %2034 = vmatmul.mubr.msk.f32.vlgmr.msra.gmra.mrb[10].mxu1 %vm124_vm0, %v2627_v13 }
 0x6e0   :  { %2143 = vmatpush3.bf16.msra.mxu1 %v2607_v7  ;;  %2044 = vmatprep.mubr.msk.f32.mxu1 %vm124_vm0, %v842_v39  ;;  %v114_v39 = vld [vmem:[#allocation2 + $0x10] sm:$0xff] }
 0x6e1   :  { %2145 = vmatprep.subr.bf16.mxu1 %v2617_v12 }
 0x6e4   :  { %2147 = vmatpush3.bf16.msra.mxu1 %v2617_v12 }
 0x6e5   :  { %2067 = vmatprep.subr.mxu1 %v2337_v11 }
 0x6e7   :  { %2045 = vmatmul.mubr.msk.f32.vlgmr.msra.gmra.mrb[10].mxu1 %vm124_vm0, %v1991_v38 }
 0x6e8   :  { %2069 = vmatprep.mubr.msk.f32.mxu1 %vm2336_vm3, %v2337_v11 }
 0x7aa   :  { %v2024_v61 = vpop.f32.mrb[8].mxu1 }
 0x7ab   :  { %v1161_v62 = vadd.f32 %v2024_v61, %v2688_v57  ;;  %v1155_v63 = vpop.f32.mrb[9].mxu1 }
 0x7ac   :  { %v1156_v0 = vadd.f32 %v2688_v57, %v1155_v63 }
 0x7ae   :  { %v2164_v3 = vpack.c.bf16 %v1161_v62, %v1156_v0 }
 0x7ba   :  { %v2046_v4 = vpop.f32.mrb[10].mxu1 }
 0x7bb   :  { %v1317_v5 = vpop.f32.mrb[11].mxu1  ;;  %v1327_v7 = vadd.f32 %v2046_v4, %v2631_v15 }
 0x7bc   :  { %v1326_v6 = vadd.f32 %v2631_v15, %v1317_v5 }
 0x7bd   :  { %v1331_v9 = vsel %vm1034_vm12, %v1327_v7, 0.0 }
 0x7be   :  { %v1328_v8 = vsel %vm124_vm0, %v1326_v6, 0.0 }
 0x7bf   :  { %1329 = vadd.xlane.f32.xlu1 %v1328_v8 }
 0x7c3   :  { %1332 = vadd.xlane.f32.xlu1 %v1331_v9 }
 0x84c   :  { %v1330_v12 = vpop.xlane.xlu1 %1329 }
 0x84d   :  { %v1334_v13 = vmul.f32 0.03125, %v1330_v12 }
 0x84f   :  { %v1336_v14 = vsub.f32 %v1326_v6, %v1334_v13 }
 0x850   :  { %v1333_v16 = vpop.xlane.xlu1 %1332 }
 0x851   :  { %v1335_v17 = vmul.f32 0.03125, %v1333_v16  ;;  %v1338_v18 = vmul.f32 %v1336_v14, %v1336_v14 }
 0x853   :  { %v1337_v19 = vsub.f32 %v1327_v7, %v1335_v17  ;;  %v1340_v1 = vsel %vm124_vm0, %v1338_v18, 0.0 }
 0x854   :  { %1341 = vadd.xlane.f32.xlu1 %v1340_v1 }
 0x855   :  { %v1339_v20 = vmul.f32 %v1337_v19, %v1337_v19 }
 0x857   :  { %v1343_v2 = vsel %vm1034_vm12, %v1339_v20, 0.0 }
 0x858   :  { %1344 = vadd.xlane.f32.xlu1 %v1343_v2 }
 0x88b   :  { %1597 = vxpose.xlu1.b32.start [1/2] (short) (narrow) %v2548_v43, 8 }
 0x88f   :  { %1598 = vxpose.xlu1.b32.end [2/2] (short) (narrow) %v2555_v44, 8  ;;  %v112_v44 = vld [vmem:[#allocation2] sm:$0xff] }
 0x890   :  { %v2157_v37 = vpack.c.bf16 %v113_v35, %v112_v44 }
 0x8e1   :  { %v1342_v15 = vpop.xlane.xlu1 %1341 }
 0x8e2   :  { %v1346_v21 = vmul.f32 0.03125, %v1342_v15 }
 0x8e4   :  { %v1348_v22 = vadd.f32 1e-05, %v1346_v21 }
 0x8e5   :  { %v1345_v23 = vpop.xlane.xlu1 %1344 }
 0x8e6   :  { %2200 = vrsqrt.f32 %v1348_v22  ;;  %v1347_v24 = vmul.f32 0.03125, %v1345_v23 }
 0x8e8   :  { %v1349_v25 = vadd.f32 1e-05, %v1347_v24 }
 0x8ea   :  { %2202 = vrsqrt.f32 %v1349_v25 }
 0x8f0   :  { %v2201_v26 = vpop.eup %2200 }
 0x8f1   :  { %v1352_v28 = vmul.f32 %v2201_v26, %v1336_v14 }
 0x8f3   :  { %v1354_v30 = vmul.f32 %v2656_v49, %v1352_v28 }
 0x8f4   :  { %v2203_v31 = vpop.eup %2202 }
 0x8f5   :  { %v1353_v32 = vmul.f32 %v2203_v31, %v1337_v19  ;;  %v1356_v33 = vadd.f32 %v2661_v51, %v1354_v30 }
 0x8f7   :  { %v1358_v34 = vmax.f32 %v1356_v33, 0.0  ;;  %v1355_v43 = vmul.f32 %v2656_v49, %v1353_v32 }
 0x8f9   :  { %2055 = vmatprep.mubr.msk.f32.mxu0 %vm124_vm0, %v1358_v34  ;;  %v1357_v36 = vadd.f32 %v2661_v51, %v1355_v43 }
 0x8fb   :  { %v1359_v38 = vmax.f32 %v1357_v36, 0.0 }
 0x8fd   :  { %2056 = vmatmul.mubr.msk.f32.vlgmr.msra.gmra.mrb[10].mxu0 %vm124_vm0, %v1359_v38 }
 0x8fe   :  { %2158 = vmatpush3.bf16.msra.mxu0 %v2157_v37  ;;  %2064 = vmatprep.mubr.msk.f32.mxu0 %vm2336_vm3, %v2337_v11 }
 0x8ff   :  { %2062 = vmatprep.subr.mxu0 %v2337_v11 }
 0x902   :  { %2063 = vmatpush3.msra.mxu0 %v114_v39 }
 0x903   :  { %2065 = vmatmul.mubr.msk.f32.vlgmr.msra.gmra.mrb[12].mxu0 %vm1442_vm13, %v1441_v40  ;;  %2163 = vmatprep.subr.bf16.mxu0 %v2335_v10 }
 0x904   :  { %2166 = vmatpush3.bf16.msk.msra.mxu0 %vm2512_vm6, %v2164_v3  ;;  %2083 = vmatprep.mubr.msk.f32.mxu0 %vm2336_vm3, %v2337_v11 }
 0x907   :  { %2084 = vmatmul.mubr.msk.f32.vlgmr.msra.gmra.mrb[14].mxu0 %vm262_vm7, %v2518_v29 }
 0x90b   :  { %v1613_v29 = vpop.trf.xlu1 }
 0x9d0   :  { %v2057_v41 = vpop.f32.mrb[10].mxu0 }
 0x9d1   :  { %v1438_v42 = vadd.f32 %v2057_v41, %v2688_v57  ;;  %v1432_v45 = vpop.f32.mrb[11].mxu0 }
 0x9d2   :  { %v1433_v46 = vadd.f32 %v2688_v57, %v1432_v45 }
 0x9d4   :  { %v2160_v47 = vpack.c.bf16 %v1438_v42, %v1433_v46 }
 0x9d6   :  { %v1512_v49 = vpop.f32.mrb[12].mxu0 }
 0x9d7   :  { %v2066_v50 = vpop.f32.mrb[13].mxu0  ;;  %2068 = vmatpush3.msk.msra.mxu1 %vm347_vm10, %v1512_v49 }
 0x9d8   :  { %2070 = vmatmul.mubr.msk.f32.vlgmr.msra.gmra.mrb[12].mxu1 %vm340_vm8, %v1516_v48  ;;  %2159 = vmatprep.subr.bf16.mxu1 %v2335_v10  ;;  %v1595_v10 = vsub.s32 0, %v1594_v58 }
 0x9d9   :  { %2162 = vmatpush3.bf16.msk.msra.mxu1 %vm2512_vm6, %v2160_v47  ;;  %2076 = vmatprep.mubr.msk.f32.mxu1 %vm2336_vm3, %v2337_v11  ;;  %vm1812_vm3 = vcmask 2048  }
 0x9da   :  { %v1774_v51 = vpop.f32.mrb[14].mxu0 }
 0x9db   :  { %v1778_v52 = vadd.f32 %v1774_v51, %v1512_v49  ;;  %v2085_v53 = vpop.f32.mrb[15].mxu0 }
 0x9dc   :  { %2077 = vmatmul.mubr.msk.f32.vlgmr.msra.gmra.mrb[14].mxu1 %vm262_vm7, %v1613_v29 }
 0x9dd   :  { %v1794_v54 = vmul.f32 %v1778_v52, %v1778_v52 }
 0x9df   :  { %v1795_v55 = vsel %vm1780_vm14, %v1794_v54, 0.0 }
 0x9e0   :  { %1796 = vadd.xlane.f32.xlu1 %v1795_v55 }
 0xa6d   :  { %v1797_v0 = vpop.xlane.xlu1 %1796 }
 0xa6e   :  { %2204 = vrsqrt.f32 %v1797_v0  ;;  %vm1800_vm15 = vcmp.eq.f32.partialorder %v1797_v0, inf  ;;  %v1803_v7 = vand.u32 2147483648, %v1797_v0  ;;  %vm1802_vm0 = vcmp.eq.f32.partialorder %v1797_v0, 0.0 }
 0xa78   :  { %v2205_v3 = vpop.eup %2204 }
 0xa79   :  { %v1799_v5 = vmul.f32 %v2205_v3, %v1797_v0 }
 0xa7b   :  { %v1801_v6 = vsel %vm1800_vm15, %v1797_v0, %v1799_v5 }
 0xa7c   :  { %v1804_v8 = vsel %vm1802_vm0, %v1803_v7, %v1801_v6 }
 0xa7d   :  { %v1805_v12 = vmax.f32 %v1804_v8, 1e-12 }
 0xaab   :  { %v1589_v59 = vpop.f32.mrb[12].mxu1 }
 0xaac   :  { %v2071_v27 = vpop.f32.mrb[13].mxu1  ;;  %v1596_v60 = vrot.slane %v1589_v59, %v1595_v10 }
 0xaaf   :  { %v1701_v57 = vpop.f32.mrb[14].mxu1 }
 0xab0   :  { %v1702_v61 = vadd.f32 %v1701_v57, %v1596_v60  ;;  %v2078_v62 = vpop.f32.mrb[15].mxu1 }
 0xab2   :  { %v1779_v11 = vmul.f32 %v1702_v61, %v1702_v61 }
 0xab4   :  { %v1781_v63 = vsel %vm1780_vm14, %v1779_v11, 0.0 }
 0xab5   :  { %1782 = vadd.xlane.f32.xlu0 %v1781_v63 }
 0xb42   :  { %v1783_v4 = vpop.xlane.xlu0 %1782 }
 0xb43   :  { %2206 = vrsqrt.f32 %v1783_v4  ;;  %vm1786_vm1 = vcmp.eq.f32.partialorder %v1783_v4, inf  ;;  %v1789_v14 = vand.u32 2147483648, %v1783_v4  ;;  %vm1788_vm2 = vcmp.eq.f32.partialorder %v1783_v4, 0.0 }
 0xb44   :  { %2208 = vrcp.f32 %v1805_v12 }
 0xb4d   :  { %v2207_v9 = vpop.eup %2206 }
 0xb4e   :  { %v1785_v13 = vmul.f32 %v2207_v9, %v1783_v4  ;;  %v2209_v19 = vpop.eup %2208 }
 0xb4f   :  { %v1807_v2 = vmul.f32 %v2209_v19, %v1778_v52 }
 0xb50   :  { %v1787_v16 = vsel %vm1786_vm1, %v1783_v4, %v1785_v13 }
 0xb51   :  { %v1790_v17 = vsel %vm1788_vm2, %v1789_v14, %v1787_v16 }
 0xb52   :  { %v1791_v18 = vmax.f32 %v1790_v17, 1e-12 }
 0xb54   :  { %2210 = vrcp.f32 %v1791_v18 }
 0xb5e   :  { %v2211_v1 = vpop.eup %2210 }
 0xb5f   :  { %v1793_v20 = vmul.f32 %v2211_v1, %v1702_v61 }
 0xb61   :  { %v1808_v15 = vmul.f32 %v1807_v2, %v1793_v20 }
 0xb63   :  { %v1809_v21 = vsel %vm1780_vm14, %v1808_v15, 0.0 }
 0xb64   :  { %1810 = vadd.xlane.f32.xlu0 %v1809_v21 }
 0xbf1   :  { %v1811_v22 = vpop.xlane.xlu0 %1810 }
 0xbf2   :  { %1813 = vst.msk [vmem:[%s2750_s15] sm:$0x7] %vm1812_vm3, %v1811_v22 }
 0xbf3   :  { %1818 = vsyncpa [#allocation3], 1 }
 0xbf4   :  { %1819 = vsyncpa [#allocation5], 1 }
 0xbf5   :  { %1820 = vsyncpa [#allocation8], 1 }

</bundles_post_ra>
